<compile_context>
chip_gen: v6e
topology: v6e:2x2x1
jax: 0.10.0
libtpu: 0.0.40
codegen_flags: <defaults>
</compile_context>

<pallas_src>
import jax
import jax.numpy as jnp
from jax import lax
from jax.experimental import pallas as pl
from jax.experimental.pallas import tpu as pltpu


def _classifier_kernel(x_ref, w_ref, b_ref, o_ref):
    # x_ref: (TB, C)   w_ref: (TV, C) — PyTorch nn.Linear layout
    # b_ref: (1, TV)   o_ref: (TB, TV)
    # Contract x dim 1 with w dim 1 -> (TB, TV); no transpose materialized.
    y = lax.dot_general(
        x_ref[...], w_ref[...],
        dimension_numbers=(((1,), (1,)), ((), ())),
        preferred_element_type=jnp.float32)
    y = y + b_ref[...].astype(jnp.float32)          # bias broadcast over rows
    o_ref[...] = jnp.maximum(y, 0.0).astype(o_ref.dtype)   # ReLU epilogue


def _pick_tile(dim, preferred, align):
    """Full extent if it fits (always legal), else preferred rounded to align."""
    if dim <= preferred:
        return dim
    return max(align, (preferred // align) * align)


def content_classifier(content_emb, weight, bias, *,
                       tile_b=256, tile_v=512, compute_dtype=None):
    """Linear(content_size -> BOW_vocab_size) + ReLU.

    content_emb: (B, C) ; weight: (V, C) PyTorch layout ; bias: (V,).
    compute_dtype: optionally cast matmul inputs (e.g. jnp.bfloat16 on
    v6e/v7x) — accumulation stays f32 via preferred_element_type.
    """
    B, C = content_emb.shape
    V, C2 = weight.shape
    assert C == C2 and bias.shape == (V,)

    out_dtype = content_emb.dtype
    if compute_dtype is not None:
        content_emb = content_emb.astype(compute_dtype)
        weight = weight.astype(compute_dtype)

    tb = _pick_tile(B, tile_b, 8)     # batch tile: MXU-row friendly
    tv = _pick_tile(V, tile_v, 128)   # vocab tile: lane-dense (multiple of 128)

    b2d = bias.reshape(1, V)          # 2-D for TPU-friendly layout

    grid = (pl.cdiv(B, tb), pl.cdiv(V, tv))

    # VMEM budget: double-buffered x / w / bias tiles + output tile, 2x headroom.
    in_bytes = jnp.dtype(content_emb.dtype).itemsize
    out_bytes = jnp.dtype(out_dtype).itemsize
    vmem_needed = (2 * (tb * C + tv * C) * in_bytes
                   + 2 * tv * jnp.dtype(bias.dtype).itemsize
                   + 2 * tb * tv * out_bytes)
    vmem_limit = int(min(128 * 1024 * 1024,
                         max(32 * 1024 * 1024, 2 * vmem_needed)))

    return pl.pallas_call(
        _classifier_kernel,
        out_shape=jax.ShapeDtypeStruct((B, V), out_dtype),
        grid_spec=pltpu.PrefetchScalarGridSpec(
            num_scalar_prefetch=0,
            grid=grid,
            in_specs=[
                pl.BlockSpec((tb, C), lambda i, j: (i, 0)),   # batch tile of x
                pl.BlockSpec((tv, C), lambda i, j: (j, 0)),   # vocab tile of W
                pl.BlockSpec((1, tv), lambda i, j: (0, j)),   # bias tile
            ],
            out_specs=pl.BlockSpec((tb, tv), lambda i, j: (i, j)),
        ),
        compiler_params=pltpu.CompilerParams(
            dimension_semantics=("parallel", "parallel"),
            vmem_limit_bytes=vmem_limit),
    )(content_emb, weight, b2d)


if __name__ == "__main__":
    key = jax.random.PRNGKey(0)
    k_x, k_w, k_b = jax.random.split(key, 3)

    # --- Small shapes implied by the module: content_size -> BOW_vocab_size ---
    batch, content_size, bow_vocab_size = 8, 32, 128
    content_emb = jax.random.normal(k_x, (batch, content_size), dtype=jnp.float32)
    weight = jax.random.normal(k_w, (bow_vocab_size, content_size),
                               dtype=jnp.float32) * 0.02
    bias = jax.random.normal(k_b, (bow_vocab_size,), dtype=jnp.float32) * 0.02

    out = jax.block_until_ready(content_classifier(content_emb, weight, bias))
    ref = jnp.maximum(content_emb @ weight.T + bias, 0.0)
    assert out.shape == (batch, bow_vocab_size)
    assert jnp.allclose(out, ref, atol=1e-5, rtol=1e-5)

    # --- Slightly larger case that exercises both grid axes (3 x 3 grid) ---
    B2, C2_, V2 = 24, 32, 384
    x2 = jax.random.normal(k_x, (B2, C2_), dtype=jnp.float32)
    w2 = jax.random.normal(k_w, (V2, C2_), dtype=jnp.float32) * 0.02
    b2 = jax.random.normal(k_b, (V2,), dtype=jnp.float32) * 0.02
    out2 = jax.block_until_ready(
        content_classifier(x2, w2, b2, tile_b=8, tile_v=128))
    ref2 = jnp.maximum(x2 @ w2.T + b2, 0.0)
    assert out2.shape == (B2, V2)
    assert jnp.allclose(out2, ref2, atol=1e-5, rtol=1e-5)

    print("KERNEL_OK")
</pallas_src>

<mosaic_0001>
module attributes {stable_mosaic.version = 11 : i64} {
  func.func @_classifier_kernel(%arg0: i32, %arg1: i32, %arg2: memref<8x32xf32, #tpu.memory_space<vmem>>, %arg3: memref<128x32xf32, #tpu.memory_space<vmem>>, %arg4: memref<1x128xf32, #tpu.memory_space<vmem>>, %arg5: memref<8x128xf32, #tpu.memory_space<vmem>>) attributes {dimension_semantics = [#tpu.dimension_semantics<parallel>, #tpu.dimension_semantics<parallel>], iteration_bounds = array<i64: 1, 1>, scalar_prefetch = 0 : i64, scratch_operands = 0 : i64, tpu.core_type = #tpu.core_type<tc>, window_params = [{transform_indices = @transform_0, window_bounds = array<i64: 8, 32>}, {transform_indices = @transform_1, window_bounds = array<i64: 128, 32>}, {transform_indices = @transform_2, window_bounds = array<i64: 1, 128>}, {transform_indices = @transform_3, window_bounds = array<i64: 8, 128>}]} {
    %c0 = arith.constant 0 : index
    %c0_0 = arith.constant 0 : index
    %0 = vector.load %arg2[%c0, %c0_0] : memref<8x32xf32, #tpu.memory_space<vmem>>, vector<8x32xf32>
    %c0_1 = arith.constant 0 : index
    %c0_2 = arith.constant 0 : index
    %1 = vector.load %arg3[%c0_1, %c0_2] : memref<128x32xf32, #tpu.memory_space<vmem>>, vector<128x32xf32>
    %cst = arith.constant dense<0.000000e+00> : vector<8x128xf32>
    %2 = tpu.matmul %0, %1, %cst {dimension_numbers = #tpu.dot_dimension_numbers<[1], [1], [0], [0], [0, 0, 1, 0], [], []>} : vector<8x32xf32>, vector<128x32xf32>, vector<8x128xf32> -> vector<8x128xf32>
    %c0_3 = arith.constant 0 : index
    %c0_4 = arith.constant 0 : index
    %3 = vector.load %arg4[%c0_3, %c0_4] : memref<1x128xf32, #tpu.memory_space<vmem>>, vector<1x128xf32>
    %4 = vector.broadcast %3 : vector<1x128xf32> to vector<8x128xf32>
    %5 = arith.addf %2, %4 : vector<8x128xf32>
    %cst_5 = arith.constant 0.000000e+00 : f32
    %6 = vector.broadcast %cst_5 : f32 to vector<8x128xf32>
    %7 = arith.maximumf %5, %6 : vector<8x128xf32>
    %c0_6 = arith.constant 0 : index
    %c0_7 = arith.constant 0 : index
    %8 = vector.load %arg5[%c0_6, %c0_7] : memref<8x128xf32, #tpu.memory_space<vmem>>, vector<8x128xf32>
    tpu.vector_store %arg5[%c0_6, %c0_7], %7 {strides = array<i32>} : memref<8x128xf32, #tpu.memory_space<vmem>>, vector<8x128xf32>,
    return
  }
  func.func @transform_0(%arg0: i32, %arg1: i32) -> (i32, i32) {
    %c0_i32 = arith.constant 0 : i32
    %c0_i32_0 = arith.constant 0 : i32
    return %arg0, %c0_i32 : i32, i32
  }
  func.func @transform_1(%arg0: i32, %arg1: i32) -> (i32, i32) {
    %c0_i32 = arith.constant 0 : i32
    %c0_i32_0 = arith.constant 0 : i32
    return %arg1, %c0_i32 : i32, i32
  }
  func.func @transform_2(%arg0: i32, %arg1: i32) -> (i32, i32) {
    %c0_i32 = arith.constant 0 : i32
    %c0_i32_0 = arith.constant 0 : i32
    return %c0_i32, %arg1 : i32, i32
  }
  func.func @transform_3(%arg0: i32, %arg1: i32) -> (i32, i32) {
    %c0_i32 = arith.constant 0 : i32
    return %arg0, %arg1 : i32, i32
  }
}

</mosaic_0001>

<bundles_post_ra>
// kernel: tpu_custom_call.1
= control target key start
LH: loop header
LB: loop body
LE: loop exit
PB: predicated region body
PF: predicated region fallthrough
CT: control target
= control target key end

     0   :  { %vm39_vm0 = vcmask 261120   ;;  %v272_v1 = vmov 0.0   ;;  %vm273_vm1 = vmmov 0   ;;  %s369_s0 = inlined_call_operand.vmem [shape: f32[8,32], index: 0, kind: input, shape index: {}]   ;;  %s370_s1 = inlined_call_operand.vmem [shape: f32[128,32], index: 1, kind: input, shape index: {}]   ;;  %s371_s2 = inlined_call_operand.vmem [shape: f32[1,128], index: 2, kind: input, shape index: {}]   ;;  %s372_s3 = inlined_call_operand.hbm [shape: f32[8,128], index: 3, kind: output, shape index: {}]  }
   0x1   :  { %v31_v0 = vld [vmem:[%s370_s1 + $0x78] sm:$0xff]  ;;  %212 = vmatprep.subr.mxu0 %v272_v1  ;;  %244 = vmatprep.mubr.msk.f32.mxu0 %vm273_vm1, %v272_v1  ;;  %v30_v2 = vld [vmem:[%s370_s1 + $0x70] sm:$0xff] }
   0x2   :  { %213 = vmatpush3.xpose.msk.msra.mxu0 %vm39_vm0, %v31_v0 }
   0x3   :  { %214 = vmatprep.subr.mxu0 %v272_v1 }
   0x6   :  { %215 = vmatpush3.xpose.msk.msra.mxu0 %vm39_vm0, %v30_v2 }
   0x7   :  { %8 = vsyncpa [#allocation3], 0  ;;  %216 = vmatprep.subr.mxu0 %v272_v1  ;;  %v29_v3 = vld [vmem:[%s370_s1 + $0x68] sm:$0xff]  ;;  %v28_v4 = vld [vmem:[%s370_s1 + $0x60] sm:$0xff]  ;;  %s274_s21 = smov [#allocation2]  }
   0x8   :  { %v27_v5 = vld [vmem:[%s370_s1 + $0x58] sm:$0xff]  ;;  %v26_v6 = vld [vmem:[%s370_s1 + $0x50] sm:$0xff]  ;;  %v25_v7 = vld [vmem:[%s370_s1 + $0x48] sm:$0xff]  ;;  %s169_s22 = sshll.u32 %s274_s21, 4  ;;  %s170_s22 = int_to_ptr.vmem [resolvable:$true] %s169_s22 }
   0x9   :  { %v24_v8 = vld [vmem:[%s370_s1 + $0x40] sm:$0xff]  ;;  %v23_v9 = vld [vmem:[%s370_s1 + $0x38] sm:$0xff]  ;;  %v22_v10 = vld [vmem:[%s370_s1 + $0x30] sm:$0xff]  ;;  %p255_p1 = scmp.lt.s32.totalorder %s170_s22, %s170_s22 }
   0xa   :  { %217 = vmatpush3.xpose.msk.msra.mxu0 %vm39_vm0, %v29_v3  ;;  %v21_v11 = vld [vmem:[%s370_s1 + $0x28] sm:$0xff]  ;;  %v20_v12 = vld [vmem:[%s370_s1 + $0x20] sm:$0xff]  ;;  %v19_v13 = vld [vmem:[%s370_s1 + $0x18] sm:$0xff] }
   0xb   :  { %218 = vmatprep.subr.mxu0 %v272_v1  ;;  %v18_v14 = vld [vmem:[%s370_s1 + $0x10] sm:$0xff]  ;;  %v17_v15 = vld [vmem:[%s370_s1 + $0x8] sm:$0xff]  ;;  %v16_v16 = vld [vmem:[%s370_s1] sm:$0xff]  ;;  %s250_s1 = scalar_lea.vmem %s170_s22, 128 }
   0xc   :  { %v15_v17 = vld [vmem:[%s369_s0] sm:$0xff]  ;;  %p251_p0 = scmp.ne.s32.totalorder %s170_s22, %s250_s1  ;;  %p256_p2 = scmp.lt.s32.totalorder %s250_s1, %s250_s1 }
   0xd   :  { %v177_v18 = vld [vmem:[%s371_s2] ss:$0 sm:$0xff] }
   0xe   :  { %219 = vmatpush3.xpose.msk.msra.mxu0 %vm39_vm0, %v28_v4  ;;  %p257_p3 = por %p256_p2, %p255_p1 }
   0xf   :  { %220 = vmatprep.subr.mxu0 %v272_v1 }
  0x10   :  { %p258_p4 = pnand %p257_p3, %p251_p0 }
  0x12   :  { %221 = vmatpush3.xpose.msk.msra.mxu0 %vm39_vm0, %v27_v5 }
  0x13   :  { %222 = vmatprep.subr.mxu0 %v272_v1 }
  0x16   :  { %223 = vmatpush3.xpose.msk.msra.mxu0 %vm39_vm0, %v26_v6 }
  0x17   :  { %224 = vmatprep.subr.mxu0 %v272_v1 }
  0x1a   :  { %225 = vmatpush3.xpose.msk.msra.mxu0 %vm39_vm0, %v25_v7 }
  0x1b   :  { %226 = vmatprep.subr.mxu0 %v272_v1 }
  0x1e   :  { %227 = vmatpush3.xpose.msk.msra.mxu0 %vm39_vm0, %v24_v8 }
  0x1f   :  { %228 = vmatprep.subr.mxu0 %v272_v1 }
  0x22   :  { %229 = vmatpush3.xpose.msk.msra.mxu0 %vm39_vm0, %v23_v9 }
  0x23   :  { %230 = vmatprep.subr.mxu0 %v272_v1 }
  0x26   :  { %231 = vmatpush3.xpose.msk.msra.mxu0 %vm39_vm0, %v22_v10 }
  0x27   :  { %232 = vmatprep.subr.mxu0 %v272_v1 }
  0x2a   :  { %233 = vmatpush3.xpose.msk.msra.mxu0 %vm39_vm0, %v21_v11 }
  0x2b   :  { %234 = vmatprep.subr.mxu0 %v272_v1 }
  0x2e   :  { %235 = vmatpush3.xpose.msk.msra.mxu0 %vm39_vm0, %v20_v12 }
  0x2f   :  { %236 = vmatprep.subr.mxu0 %v272_v1 }
  0x32   :  { %237 = vmatpush3.xpose.msk.msra.mxu0 %vm39_vm0, %v19_v13 }
  0x33   :  { %238 = vmatprep.subr.mxu0 %v272_v1 }
  0x36   :  { %239 = vmatpush3.xpose.msk.msra.mxu0 %vm39_vm0, %v18_v14 }
  0x37   :  { %240 = vmatprep.subr.mxu0 %v272_v1 }
  0x3a   :  { %241 = vmatpush3.xpose.msk.msra.mxu0 %vm39_vm0, %v17_v15 }
  0x3b   :  { %242 = vmatprep.subr.mxu0 %v272_v1 }
  0x3e   :  { %243 = vmatpush3.xpose.msk.msra.mxu0 %vm39_vm0, %v16_v16 }
  0x41   :  { %245 = vmatmul.mubr.msk.f32.vlgmr.msra.gmra.mxu0 %vm39_vm0, %v15_v17 }
 0x101   :  { %v157_v19 = vpop.f32.mrf.mxu0 }
 0x102   :  { %v158_v20 = vadd.f32 %v177_v18, %v157_v19 }
 0x103   :  { %v246_v21 = vpop.f32.mrf.mxu0 }
 0x104   :  { %v161_v22 = vmax.f32 %v158_v20, 0.0 }
 0x106   :  { %162 = vst [vmem:[#allocation2] sm:$0xff] %v161_v22 }
 0x107   :  { %261 = shalt.err (!%p258_p4)
}
 0x108   :  { %172 = dma.vmem_to_hbm [thread:$0]  %s170_s22, 128, %s372_s3, [#allocation3]  }
 0x109   :  { %270 = dma.done.wait [#allocation3], 128  }
 0x10a   :  { %271 = vsyncadd [#allocation3], 4294967168 }
 0x10b   :  { %176 = vsyncpa [#allocation3], 1 }

</bundles_post_ra>
